<compile_context>
chip_gen: v6e
topology: v6e:2x2x1
jax: 0.10.0
libtpu: 0.0.40
codegen_flags: <defaults>
</compile_context>

<pallas_src>
import functools

import jax
import jax.numpy as jnp
from jax.experimental import pallas as pl
from jax.experimental.pallas import tpu as pltpu

K = 10   # ConvTranspose1d kernel_size
PAD = 4  # ConvTranspose1d padding


def heatmap_kernel(taps_ref, w_ref, bias_ref, z_ref, q_ref, *, t_valid):
    """taps_ref: [K, Bb, Tp]  w_ref: [K, C, Tp]  bias_ref: [C, Tp]
       z_ref:    [Bb, C, Tp]  q_ref: [Bb, C]     (Tp = T rounded up to 128)"""
    Bb, C, Tp = z_ref.shape
    n_taps = taps_ref.shape[0]

    # --- transposed conv as a 10-tap correlation; bias folded into the init ---
    acc = jnp.broadcast_to(bias_ref[...], (Bb, C, Tp))
    for j in range(n_taps):                       # static unroll; all reads aligned full tiles
        acc = acc + w_ref[j][None, :, :] * taps_ref[j][:, None, :]

    # --- ReLU + lane-dense store (Tp multiple of 128) ---
    z = jnp.maximum(acc, 0.0)
    z_ref[...] = z

    # --- max over time of softmax(time)  ==  1 / sum_t exp(z_t - max_t z) ---
    if t_valid < Tp:                              # mask padded time lanes out of reductions
        t_idx = jax.lax.broadcasted_iota(jnp.int32, (Bb, C, Tp), 2)
        z = jnp.where(t_idx < t_valid, z, -jnp.inf)
    m = jnp.max(z, axis=2, keepdims=True)         # [Bb, C, 1]
    s = jnp.sum(jnp.exp(z - m), axis=2)           # [Bb, C]
    q = pl.reciprocal(s)                          # exact; approx=True is a free further tweak

    # --- softmax over channels ---
    qm = jnp.max(q, axis=1, keepdims=True)
    qe = jnp.exp(q - qm)
    q_ref[...] = qe * pl.reciprocal(jnp.sum(qe, axis=1, keepdims=True))


def heatmapnet_forward(Z, weight, bias, pooling, *, batch_block=None):
    """Z: [B, n_hidden] f32; weight: [1, C, K] (PyTorch ConvTranspose1d layout); bias: [C].

    batch_block: optional batch tile (must divide B and equal B or be a multiple of 8);
    with the default (full batch) the grid is (1,). When B grows, a smaller batch_block
    shards grid steps across v7x's two TensorCores via dimension_semantics=("parallel",).
    """
    B, H = Z.shape
    C = weight.shape[1]
    L = H * pooling
    T = L + 1 - pooling                            # (L + K - 1 - 2*PAD) - pooling
    Tp = ((T + 127) // 128) * 128                  # lane-dense time width
    Bb = B if batch_block is None else batch_block

    # glue (pure layout, done in XLA): nearest upsample, zero-pad, reverse taps,
    # im2col-stack the K shifted copies, pre-broadcast weights & bias along the lane axis.
    pad = K - 1 - PAD
    x_up = jnp.repeat(Z.astype(jnp.float32), pooling, axis=-1)              # [B, L]
    extra = max(0, (K - 1) + Tp - (L + 2 * pad))
    xp = jnp.pad(x_up, ((0, 0), (pad, pad + extra)))                        # [B, >= K-1+Tp]
    taps = jnp.stack([xp[:, j:j + Tp] for j in range(K)], axis=0)           # [K, B, Tp]
    wrev = weight[0, :, ::-1].astype(jnp.float32)                           # [C, K]
    wbc = jnp.broadcast_to(wrev.T[:, :, None], (K, C, Tp))                  # [K, C, Tp]
    bias_bc = jnp.broadcast_to(bias.astype(jnp.float32)[:, None], (C, Tp))  # [C, Tp]

    kernel = functools.partial(heatmap_kernel, t_valid=T)
    z_pad, q_out = pl.pallas_call(
        kernel,
        grid=(pl.cdiv(B, Bb),),
        in_specs=[
            pl.BlockSpec((K, Bb, Tp), lambda i: (0, i, 0)),
            pl.BlockSpec((K, C, Tp), lambda i: (0, 0, 0)),
            pl.BlockSpec((C, Tp), lambda i: (0, 0)),
        ],
        out_specs=[
            pl.BlockSpec((Bb, C, Tp), lambda i: (i, 0, 0)),
            pl.BlockSpec((Bb, C), lambda i: (i, 0)),
        ],
        out_shape=[
            jax.ShapeDtypeStruct((B, C, Tp), jnp.float32),
            jax.ShapeDtypeStruct((B, C), jnp.float32),
        ],
        compiler_params=pltpu.CompilerParams(dimension_semantics=("parallel",)),
    )(taps, wbc, bias_bc)

    return z_pad[:, :, :T], q_out


def reference_forward(Z, weight, bias, pooling):
    """Pure-JAX reference built from the scatter definition of ConvTranspose1d."""
    B, H = Z.shape
    C = weight.shape[1]
    L = H * pooling
    x_up = jnp.repeat(Z, pooling, axis=-1)                                  # [B, L]
    out_full = jnp.zeros((B, C, L + K - 1), jnp.float32)
    for k in range(K):
        out_full = out_full.at[:, :, k:k + L].add(
            x_up[:, None, :] * weight[0, :, k][None, :, None])
    # crop the transposed-conv padding, then the trailing `[:-pool]` slice
    out = out_full[:, :, PAD:PAD + L + 1 - pooling] + bias[None, :, None]
    z = jnp.maximum(out, 0.0)
    p = jax.nn.softmax(z, axis=2)
    q = jax.nn.softmax(jnp.max(p, axis=2), axis=1)
    return z, q


if __name__ == "__main__":
    # args: n_clusters=8, n_hidden=32, pool=4  ->  input Z: [2, 32]
    B, H, C, pooling = 2, 32, 8, 4
    key = jax.random.PRNGKey(0)
    k_in, k_w, k_b = jax.random.split(key, 3)

    Z = jax.random.normal(k_in, (B, H), jnp.float32)
    # deterministic parameter init (uniform, PyTorch-default-like range)
    bound = 1.0 / (1 * K) ** 0.5
    weight = jax.random.uniform(k_w, (1, C, K), jnp.float32, -bound, bound)
    bias = jax.random.uniform(k_b, (C,), jnp.float32, -bound, bound)

    z_out, q_out = heatmapnet_forward(Z, weight, bias, pooling)
    jax.block_until_ready((z_out, q_out))

    z_ref, q_ref = reference_forward(Z, weight, bias, pooling)
    T = H * pooling + 1 - pooling
    assert z_out.shape == (B, C, T)
    assert q_out.shape == (B, C)
    assert jnp.allclose(z_out, z_ref, atol=1e-5, rtol=1e-5)
    assert jnp.allclose(q_out, q_ref, atol=1e-5, rtol=1e-5)
    print("KERNEL_OK")
</pallas_src>

<mosaic_0001>
module attributes {stable_mosaic.version = 11 : i64} {
  func.func @heatmap_kernel(%arg0: i32, %arg1: memref<10x2x128xf32, #tpu.memory_space<vmem>>, %arg2: memref<10x8x128xf32, #tpu.memory_space<vmem>>, %arg3: memref<8x128xf32, #tpu.memory_space<vmem>>, %arg4: memref<2x8x128xf32, #tpu.memory_space<vmem>>, %arg5: memref<2x8xf32, #tpu.memory_space<vmem>>) attributes {dimension_semantics = [#tpu.dimension_semantics<parallel>], iteration_bounds = array<i64: 1>, scalar_prefetch = 0 : i64, scratch_operands = 0 : i64, tpu.core_type = #tpu.core_type<tc>, window_params = [{transform_indices = @transform_0, window_bounds = array<i64: 10, 2, 128>}, {pipeline_mode = #tpu.pipeline_mode<synchronous>, transform_indices = @transform_1, window_bounds = array<i64: 10, 8, 128>}, {pipeline_mode = #tpu.pipeline_mode<synchronous>, transform_indices = @transform_2, window_bounds = array<i64: 8, 128>}, {transform_indices = @transform_3, window_bounds = array<i64: 2, 8, 128>}, {transform_indices = @transform_4, window_bounds = array<i64: 2, 8>}]} {
    %c0 = arith.constant 0 : index
    %c0_0 = arith.constant 0 : index
    %0 = vector.load %arg3[%c0, %c0_0] : memref<8x128xf32, #tpu.memory_space<vmem>>, vector<8x128xf32>
    %1 = vector.shape_cast %0 : vector<8x128xf32> to vector<1x8x128xf32>
    %2 = vector.broadcast %1 : vector<1x8x128xf32> to vector<2x8x128xf32>
    %c0_1 = arith.constant 0 : index
    %c0_2 = arith.constant 0 : index
    %c0_3 = arith.constant 0 : index
    %3 = vector.load %arg2[%c0_1, %c0_2, %c0_3] : memref<10x8x128xf32, #tpu.memory_space<vmem>>, vector<1x8x128xf32>
    %4 = vector.shape_cast %3 : vector<1x8x128xf32> to vector<8x128xf32>
    %5 = vector.shape_cast %4 : vector<8x128xf32> to vector<1x8x128xf32>
    %c0_4 = arith.constant 0 : index
    %c0_5 = arith.constant 0 : index
    %c0_6 = arith.constant 0 : index
    %6 = vector.load %arg1[%c0_4, %c0_5, %c0_6] : memref<10x2x128xf32, #tpu.memory_space<vmem>>, vector<1x2x128xf32>
    %7 = vector.shape_cast %6 : vector<1x2x128xf32> to vector<2x128xf32>
    %8 = vector.shape_cast %7 : vector<2x128xf32> to vector<2x1x128xf32>
    %9 = vector.broadcast %5 : vector<1x8x128xf32> to vector<2x8x128xf32>
    %10 = vector.broadcast %8 : vector<2x1x128xf32> to vector<2x8x128xf32>
    %11 = arith.mulf %9, %10 : vector<2x8x128xf32>
    %12 = arith.addf %2, %11 : vector<2x8x128xf32>
    %c1 = arith.constant 1 : index
    %c0_7 = arith.constant 0 : index
    %c0_8 = arith.constant 0 : index
    %13 = vector.load %arg2[%c1, %c0_7, %c0_8] : memref<10x8x128xf32, #tpu.memory_space<vmem>>, vector<1x8x128xf32>
    %14 = vector.shape_cast %13 : vector<1x8x128xf32> to vector<8x128xf32>
    %15 = vector.shape_cast %14 : vector<8x128xf32> to vector<1x8x128xf32>
    %c1_9 = arith.constant 1 : index
    %c0_10 = arith.constant 0 : index
    %c0_11 = arith.constant 0 : index
    %16 = vector.load %arg1[%c1_9, %c0_10, %c0_11] : memref<10x2x128xf32, #tpu.memory_space<vmem>>, vector<1x2x128xf32>
    %17 = vector.shape_cast %16 : vector<1x2x128xf32> to vector<2x128xf32>
    %18 = vector.shape_cast %17 : vector<2x128xf32> to vector<2x1x128xf32>
    %19 = vector.broadcast %15 : vector<1x8x128xf32> to vector<2x8x128xf32>
    %20 = vector.broadcast %18 : vector<2x1x128xf32> to vector<2x8x128xf32>
    %21 = arith.mulf %19, %20 : vector<2x8x128xf32>
    %22 = arith.addf %12, %21 : vector<2x8x128xf32>
    %c2 = arith.constant 2 : index
    %c0_12 = arith.constant 0 : index
    %c0_13 = arith.constant 0 : index
    %23 = vector.load %arg2[%c2, %c0_12, %c0_13] : memref<10x8x128xf32, #tpu.memory_space<vmem>>, vector<1x8x128xf32>
    %24 = vector.shape_cast %23 : vector<1x8x128xf32> to vector<8x128xf32>
    %25 = vector.shape_cast %24 : vector<8x128xf32> to vector<1x8x128xf32>
    %c2_14 = arith.constant 2 : index
    %c0_15 = arith.constant 0 : index
    %c0_16 = arith.constant 0 : index
    %26 = vector.load %arg1[%c2_14, %c0_15, %c0_16] : memref<10x2x128xf32, #tpu.memory_space<vmem>>, vector<1x2x128xf32>
    %27 = vector.shape_cast %26 : vector<1x2x128xf32> to vector<2x128xf32>
    %28 = vector.shape_cast %27 : vector<2x128xf32> to vector<2x1x128xf32>
    %29 = vector.broadcast %25 : vector<1x8x128xf32> to vector<2x8x128xf32>
    %30 = vector.broadcast %28 : vector<2x1x128xf32> to vector<2x8x128xf32>
    %31 = arith.mulf %29, %30 : vector<2x8x128xf32>
    %32 = arith.addf %22, %31 : vector<2x8x128xf32>
    %c3 = arith.constant 3 : index
    %c0_17 = arith.constant 0 : index
    %c0_18 = arith.constant 0 : index
    %33 = vector.load %arg2[%c3, %c0_17, %c0_18] : memref<10x8x128xf32, #tpu.memory_space<vmem>>, vector<1x8x128xf32>
    %34 = vector.shape_cast %33 : vector<1x8x128xf32> to vector<8x128xf32>
    %35 = vector.shape_cast %34 : vector<8x128xf32> to vector<1x8x128xf32>
    %c3_19 = arith.constant 3 : index
    %c0_20 = arith.constant 0 : index
    %c0_21 = arith.constant 0 : index
    %36 = vector.load %arg1[%c3_19, %c0_20, %c0_21] : memref<10x2x128xf32, #tpu.memory_space<vmem>>, vector<1x2x128xf32>
    %37 = vector.shape_cast %36 : vector<1x2x128xf32> to vector<2x128xf32>
    %38 = vector.shape_cast %37 : vector<2x128xf32> to vector<2x1x128xf32>
    %39 = vector.broadcast %35 : vector<1x8x128xf32> to vector<2x8x128xf32>
    %40 = vector.broadcast %38 : vector<2x1x128xf32> to vector<2x8x128xf32>
    %41 = arith.mulf %39, %40 : vector<2x8x128xf32>
    %42 = arith.addf %32, %41 : vector<2x8x128xf32>
    %c4 = arith.constant 4 : index
    %c0_22 = arith.constant 0 : index
    %c0_23 = arith.constant 0 : index
    %43 = vector.load %arg2[%c4, %c0_22, %c0_23] : memref<10x8x128xf32, #tpu.memory_space<vmem>>, vector<1x8x128xf32>
    %44 = vector.shape_cast %43 : vector<1x8x128xf32> to vector<8x128xf32>
    %45 = vector.shape_cast %44 : vector<8x128xf32> to vector<1x8x128xf32>
    %c4_24 = arith.constant 4 : index
    %c0_25 = arith.constant 0 : index
    %c0_26 = arith.constant 0 : index
    %46 = vector.load %arg1[%c4_24, %c0_25, %c0_26] : memref<10x2x128xf32, #tpu.memory_space<vmem>>, vector<1x2x128xf32>
    %47 = vector.shape_cast %46 : vector<1x2x128xf32> to vector<2x128xf32>
    %48 = vector.shape_cast %47 : vector<2x128xf32> to vector<2x1x128xf32>
    %49 = vector.broadcast %45 : vector<1x8x128xf32> to vector<2x8x128xf32>
    %50 = vector.broadcast %48 : vector<2x1x128xf32> to vector<2x8x128xf32>
    %51 = arith.mulf %49, %50 : vector<2x8x128xf32>
    %52 = arith.addf %42, %51 : vector<2x8x128xf32>
    %c5 = arith.constant 5 : index
    %c0_27 = arith.constant 0 : index
    %c0_28 = arith.constant 0 : index
    %53 = vector.load %arg2[%c5, %c0_27, %c0_28] : memref<10x8x128xf32, #tpu.memory_space<vmem>>, vector<1x8x128xf32>
    %54 = vector.shape_cast %53 : vector<1x8x128xf32> to vector<8x128xf32>
    %55 = vector.shape_cast %54 : vector<8x128xf32> to vector<1x8x128xf32>
    %c5_29 = arith.constant 5 : index
    %c0_30 = arith.constant 0 : index
    %c0_31 = arith.constant 0 : index
    %56 = vector.load %arg1[%c5_29, %c0_30, %c0_31] : memref<10x2x128xf32, #tpu.memory_space<vmem>>, vector<1x2x128xf32>
    %57 = vector.shape_cast %56 : vector<1x2x128xf32> to vector<2x128xf32>
    %58 = vector.shape_cast %57 : vector<2x128xf32> to vector<2x1x128xf32>
    %59 = vector.broadcast %55 : vector<1x8x128xf32> to vector<2x8x128xf32>
    %60 = vector.broadcast %58 : vector<2x1x128xf32> to vector<2x8x128xf32>
    %61 = arith.mulf %59, %60 : vector<2x8x128xf32>
    %62 = arith.addf %52, %61 : vector<2x8x128xf32>
    %c6 = arith.constant 6 : index
    %c0_32 = arith.constant 0 : index
    %c0_33 = arith.constant 0 : index
    %63 = vector.load %arg2[%c6, %c0_32, %c0_33] : memref<10x8x128xf32, #tpu.memory_space<vmem>>, vector<1x8x128xf32>
    %64 = vector.shape_cast %63 : vector<1x8x128xf32> to vector<8x128xf32>
    %65 = vector.shape_cast %64 : vector<8x128xf32> to vector<1x8x128xf32>
    %c6_34 = arith.constant 6 : index
    %c0_35 = arith.constant 0 : index
    %c0_36 = arith.constant 0 : index
    %66 = vector.load %arg1[%c6_34, %c0_35, %c0_36] : memref<10x2x128xf32, #tpu.memory_space<vmem>>, vector<1x2x128xf32>
    %67 = vector.shape_cast %66 : vector<1x2x128xf32> to vector<2x128xf32>
    %68 = vector.shape_cast %67 : vector<2x128xf32> to vector<2x1x128xf32>
    %69 = vector.broadcast %65 : vector<1x8x128xf32> to vector<2x8x128xf32>
    %70 = vector.broadcast %68 : vector<2x1x128xf32> to vector<2x8x128xf32>
    %71 = arith.mulf %69, %70 : vector<2x8x128xf32>
    %72 = arith.addf %62, %71 : vector<2x8x128xf32>
    %c7 = arith.constant 7 : index
    %c0_37 = arith.constant 0 : index
    %c0_38 = arith.constant 0 : index
    %73 = vector.load %arg2[%c7, %c0_37, %c0_38] : memref<10x8x128xf32, #tpu.memory_space<vmem>>, vector<1x8x128xf32>
    %74 = vector.shape_cast %73 : vector<1x8x128xf32> to vector<8x128xf32>
    %75 = vector.shape_cast %74 : vector<8x128xf32> to vector<1x8x128xf32>
    %c7_39 = arith.constant 7 : index
    %c0_40 = arith.constant 0 : index
    %c0_41 = arith.constant 0 : index
    %76 = vector.load %arg1[%c7_39, %c0_40, %c0_41] : memref<10x2x128xf32, #tpu.memory_space<vmem>>, vector<1x2x128xf32>
    %77 = vector.shape_cast %76 : vector<1x2x128xf32> to vector<2x128xf32>
    %78 = vector.shape_cast %77 : vector<2x128xf32> to vector<2x1x128xf32>
    %79 = vector.broadcast %75 : vector<1x8x128xf32> to vector<2x8x128xf32>
    %80 = vector.broadcast %78 : vector<2x1x128xf32> to vector<2x8x128xf32>
    %81 = arith.mulf %79, %80 : vector<2x8x128xf32>
    %82 = arith.addf %72, %81 : vector<2x8x128xf32>
    %c8 = arith.constant 8 : index
    %c0_42 = arith.constant 0 : index
    %c0_43 = arith.constant 0 : index
    %83 = vector.load %arg2[%c8, %c0_42, %c0_43] : memref<10x8x128xf32, #tpu.memory_space<vmem>>, vector<1x8x128xf32>
    %84 = vector.shape_cast %83 : vector<1x8x128xf32> to vector<8x128xf32>
    %85 = vector.shape_cast %84 : vector<8x128xf32> to vector<1x8x128xf32>
    %c8_44 = arith.constant 8 : index
    %c0_45 = arith.constant 0 : index
    %c0_46 = arith.constant 0 : index
    %86 = vector.load %arg1[%c8_44, %c0_45, %c0_46] : memref<10x2x128xf32, #tpu.memory_space<vmem>>, vector<1x2x128xf32>
    %87 = vector.shape_cast %86 : vector<1x2x128xf32> to vector<2x128xf32>
    %88 = vector.shape_cast %87 : vector<2x128xf32> to vector<2x1x128xf32>
    %89 = vector.broadcast %85 : vector<1x8x128xf32> to vector<2x8x128xf32>
    %90 = vector.broadcast %88 : vector<2x1x128xf32> to vector<2x8x128xf32>
    %91 = arith.mulf %89, %90 : vector<2x8x128xf32>
    %92 = arith.addf %82, %91 : vector<2x8x128xf32>
    %c9 = arith.constant 9 : index
    %c0_47 = arith.constant 0 : index
    %c0_48 = arith.constant 0 : index
    %93 = vector.load %arg2[%c9, %c0_47, %c0_48] : memref<10x8x128xf32, #tpu.memory_space<vmem>>, vector<1x8x128xf32>
    %94 = vector.shape_cast %93 : vector<1x8x128xf32> to vector<8x128xf32>
    %95 = vector.shape_cast %94 : vector<8x128xf32> to vector<1x8x128xf32>
    %c9_49 = arith.constant 9 : index
    %c0_50 = arith.constant 0 : index
    %c0_51 = arith.constant 0 : index
    %96 = vector.load %arg1[%c9_49, %c0_50, %c0_51] : memref<10x2x128xf32, #tpu.memory_space<vmem>>, vector<1x2x128xf32>
    %97 = vector.shape_cast %96 : vector<1x2x128xf32> to vector<2x128xf32>
    %98 = vector.shape_cast %97 : vector<2x128xf32> to vector<2x1x128xf32>
    %99 = vector.broadcast %95 : vector<1x8x128xf32> to vector<2x8x128xf32>
    %100 = vector.broadcast %98 : vector<2x1x128xf32> to vector<2x8x128xf32>
    %101 = arith.mulf %99, %100 : vector<2x8x128xf32>
    %102 = arith.addf %92, %101 : vector<2x8x128xf32>
    %cst = arith.constant 0.000000e+00 : f32
    %103 = vector.broadcast %cst : f32 to vector<2x8x128xf32>
    %104 = arith.maximumf %102, %103 : vector<2x8x128xf32>
    %c0_52 = arith.constant 0 : index
    %c0_53 = arith.constant 0 : index
    %c0_54 = arith.constant 0 : index
    %105 = vector.load %arg4[%c0_52, %c0_53, %c0_54] : memref<2x8x128xf32, #tpu.memory_space<vmem>>, vector<2x8x128xf32>
    tpu.vector_store %arg4[%c0_52, %c0_53, %c0_54], %104 {strides = array<i32>} : memref<2x8x128xf32, #tpu.memory_space<vmem>>, vector<2x8x128xf32>,
    %106 = tpu.iota {dimensions = array<i32: 2>} : vector<2x8x128xi32>
    %c125_i32 = arith.constant 125 : i32
    %107 = vector.broadcast %c125_i32 : i32 to vector<2x8x128xi32>
    %108 = arith.cmpi slt, %106, %107 : vector<2x8x128xi32>
    %cst_55 = arith.constant 0xFF800000 : f32
    %109 = vector.broadcast %cst_55 : f32 to vector<2x8x128xf32>
    %110 = arith.select %108, %104, %109 : vector<2x8x128xi1>, vector<2x8x128xf32>
    %cst_56 = arith.constant dense<0xFF800000> : vector<2x8xf32>
    %111 = vector.multi_reduction <maximumf>, %110, %cst_56 [2] : vector<2x8x128xf32> to vector<2x8xf32>
    %112 = vector.shape_cast %111 : vector<2x8xf32> to vector<2x8x1xf32>
    %113 = vector.broadcast %112 : vector<2x8x1xf32> to vector<2x8x128xf32>
    %114 = arith.subf %110, %113 : vector<2x8x128xf32>
    %115 = math.exp %114 : vector<2x8x128xf32>
    %cst_57 = arith.constant dense<0.000000e+00> : vector<2x8xf32>
    %116 = vector.multi_reduction <add>, %115, %cst_57 [2] : vector<2x8x128xf32> to vector<2x8xf32>
    %117 = tpu.reciprocal %116 : vector<2x8xf32> -> vector<2x8xf32>
    %cst_58 = arith.constant dense<0xFF800000> : vector<2xf32>
    %118 = vector.multi_reduction <maximumf>, %117, %cst_58 [1] : vector<2x8xf32> to vector<2xf32>
    %119 = vector.shape_cast %118 : vector<2xf32> to vector<2x1xf32>
    %120 = vector.broadcast %119 : vector<2x1xf32> to vector<2x8xf32>
    %121 = arith.subf %117, %120 : vector<2x8xf32>
    %122 = math.exp %121 : vector<2x8xf32>
    %cst_59 = arith.constant dense<0.000000e+00> : vector<2xf32>
    %123 = vector.multi_reduction <add>, %122, %cst_59 [1] : vector<2x8xf32> to vector<2xf32>
    %124 = vector.shape_cast %123 : vector<2xf32> to vector<2x1xf32>
    %125 = tpu.reciprocal %124 : vector<2x1xf32> -> vector<2x1xf32>
    %126 = vector.broadcast %125 : vector<2x1xf32> to vector<2x8xf32>
    %127 = arith.mulf %122, %126 : vector<2x8xf32>
    %c0_60 = arith.constant 0 : index
    %c0_61 = arith.constant 0 : index
    %128 = vector.load %arg5[%c0_60, %c0_61] : memref<2x8xf32, #tpu.memory_space<vmem>>, vector<2x8xf32>
    tpu.vector_store %arg5[%c0_60, %c0_61], %127 {strides = array<i32>} : memref<2x8xf32, #tpu.memory_space<vmem>>, vector<2x8xf32>,
    return
  }
  func.func @transform_0(%arg0: i32) -> (i32, i32, i32) {
    %c0_i32 = arith.constant 0 : i32
    %c0_i32_0 = arith.constant 0 : i32
    %c0_i32_1 = arith.constant 0 : i32
    return %c0_i32, %arg0, %c0_i32_0 : i32, i32, i32
  }
  func.func @transform_1(%arg0: i32) -> (i32, i32, i32) {
    %c0_i32 = arith.constant 0 : i32
    %c0_i32_0 = arith.constant 0 : i32
    %c0_i32_1 = arith.constant 0 : i32
    %c0_i32_2 = arith.constant 0 : i32
    return %c0_i32, %c0_i32_0, %c0_i32_1 : i32, i32, i32
  }
  func.func @transform_2(%arg0: i32) -> (i32, i32) {
    %c0_i32 = arith.constant 0 : i32
    %c0_i32_0 = arith.constant 0 : i32
    %c0_i32_1 = arith.constant 0 : i32
    return %c0_i32, %c0_i32_0 : i32, i32
  }
  func.func @transform_3(%arg0: i32) -> (i32, i32, i32) {
    %c0_i32 = arith.constant 0 : i32
    %c0_i32_0 = arith.constant 0 : i32
    %c0_i32_1 = arith.constant 0 : i32
    return %arg0, %c0_i32, %c0_i32_0 : i32, i32, i32
  }
  func.func @transform_4(%arg0: i32) -> (i32, i32) {
    %c0_i32 = arith.constant 0 : i32
    %c0_i32_0 = arith.constant 0 : i32
    return %arg0, %c0_i32 : i32, i32
  }
}

</mosaic_0001>

<bundles_post_ra>
// kernel: tpu_custom_call.1
= control target key start
LH: loop header
LB: loop body
LE: loop exit
PB: predicated region body
PF: predicated region fallthrough
CT: control target
= control target key end

     0   :  { %10 = vsyncpa [#allocation3], 0  ;;  %s881_s0 = inlined_call_operand.hbm [shape: f32[10,2,128], index: 0, kind: input, shape index: {}]   ;;  %s882_s1 = inlined_call_operand.hbm [shape: f32[10,8,128], index: 1, kind: input, shape index: {}]   ;;  %s883_s2 = inlined_call_operand.hbm [shape: f32[8,128], index: 2, kind: input, shape index: {}]   ;;  %s884_s3 = inlined_call_operand.hbm [shape: f32[2,8,128], index: 3, kind: output, shape index: {0}]   ;;  %s885_s4 = inlined_call_operand.hbm [shape: f32[2,8], index: 4, kind: output, shape index: {1}]  }
   0x1   :  { %11 = vsyncpa [#allocation6], 0 }
   0x2   :  { %12 = vsyncpa [#allocation4], 0 }
   0x3   :  { %13 = vsyncpa [#allocation10], 0  ;;  %s756_s15 = smov [#allocation5]  }
   0x4   :  { %s31_s16 = sshll.u32 %s756_s15, 4  ;;  %s32_s16 = int_to_ptr.vmem [resolvable:$true] %s31_s16 }
   0x5   :  { %s656_s17 = scalar_lea.vmem %s32_s16, 1280  ;;  %p661_p1 = scmp.lt.s32.totalorder %s32_s16, %s32_s16 }
   0x6   :  { %p657_p0 = scmp.ne.s32.totalorder %s32_s16, %s656_s17  ;;  %p662_p2 = scmp.lt.s32.totalorder %s656_s17, %s656_s17 }
   0x8   :  { %p663_p3 = por %p662_p2, %p661_p1 }
   0xa   :  { %p664_p4 = pnand %p663_p3, %p657_p0 }
   0xc   :  { %667 = shalt.err (!%p664_p4)
}
   0xd   :  { %s757_s18 = smov 128   ;;  %s758_s19 = smov 8  }
   0xe   :  { %37 = dma.hbm_to_vmem [thread:$0]  %s882_s1, 1280, %s32_s16, [#allocation6], %s757_s18, %s757_s18, %s758_s19  }
   0xf   :  { %s759_s22 = smov [#allocation2]  }
  0x10   :  { %s19_s23 = sshll.u32 %s759_s22, 4  ;;  %s20_s23 = int_to_ptr.vmem [resolvable:$true] %s19_s23 }
  0x11   :  { %s676_s24 = scalar_lea.vmem %s20_s23, 320  ;;  %p681_p6 = scmp.lt.s32.totalorder %s20_s23, %s20_s23 }
  0x12   :  { %p677_p5 = scmp.ne.s32.totalorder %s20_s23, %s676_s24  ;;  %p682_p7 = scmp.lt.s32.totalorder %s676_s24, %s676_s24 }
  0x14   :  { %p683_p8 = por %p682_p7, %p681_p6 }
  0x16   :  { %p684_p9 = pnand %p683_p8, %p677_p5 }
  0x18   :  { %687 = shalt.err (!%p684_p9)
}
  0x19   :  { %s760_s25 = smov 32   ;;  %s761_s26 = smov 2  }
  0x1a   :  { %25 = dma.hbm_to_vmem [thread:$0]  %s881_s0, 320, %s20_s23, [#allocation3], %s760_s25, %s760_s25, %s761_s26  }
  0x1b   :  { %s762_s29 = smov [#allocation7]  }
  0x1c   :  { %s44_s30 = sshll.u32 %s762_s29, 4  ;;  %s45_s30 = int_to_ptr.vmem [resolvable:$true] %s44_s30 }
  0x1d   :  { %s696_s1 = scalar_lea.vmem %s45_s30, 128  ;;  %p701_p11 = scmp.lt.s32.totalorder %s45_s30, %s45_s30 }
  0x1e   :  { %p697_p10 = scmp.ne.s32.totalorder %s45_s30, %s696_s1  ;;  %p702_p12 = scmp.lt.s32.totalorder %s696_s1, %s696_s1 }
  0x20   :  { %p703_p13 = por %p702_p12, %p701_p11 }
  0x22   :  { %p704_p0 = pnand %p703_p13, %p697_p10 }
  0x24   :  { %707 = shalt.err (!%p704_p0)
}
  0x25   :  { %47 = dma.hbm_to_vmem [thread:$0]  %s883_s2, 128, %s45_s30, [#allocation6]  }
  0x26   :  { %748 = dma.done.wait [#allocation3], 320  }
  0x27   :  { %749 = vsyncadd [#allocation3], 4294966976 }
  0x28   :  { %750 = dma.done.wait [#allocation6], 1408  }
  0x29   :  { %751 = vsyncadd [#allocation6], 4294965888  ;;  %v72_v0 = vlaneseq  ;;  %v763_v1 = vmov 1966171168   ;;  %v58_v11 = vld [vmem:[#allocation5] sm:$0xff]  ;;  %v98_v16 = vld [vmem:[#allocation5 + $0x8] sm:$0xff] }
  0x2a   :  { %v70_v2 = vunpack.c.l.s4 %v763_v1  ;;  %v611_v7 = vld.sshfl [vmem:[#allocation2] sm:$0x11 pattern:$0x75316420]  ;;  %v57_v20 = vld [vmem:[#allocation7] sm:$0xff]  ;;  %v180_v33 = vld [vmem:[#allocation5 + $0x18] sm:$0xff] }
  0x2b   :  { %v805_v3 = vshrl.u32 %v72_v0, 7  ;;  %v612_v9 = vld.sshfl [vmem:[#allocation2 + $0x2] sm:$0x11 pattern:$0x75316420]  ;;  %v68_v10 = vcombine.high %v611_v7, %v611_v7  ;;  %v139_v22 = vld [vmem:[#allocation5 + $0x10] sm:$0xff] }
  0x2c   :  { %v71_v4 = vunpack.c.0.s8 %v70_v2  ;;  %v613_v13 = vld.sshfl [vmem:[#allocation2 + $0x4] sm:$0x11 pattern:$0x75316420]  ;;  %v109_v14 = vcombine.high %v612_v9, %v612_v9  ;;  %v221_v43 = vld [vmem:[#allocation5 + $0x20] sm:$0xff]  ;;  %v262_v44 = vld [vmem:[#allocation5 + $0x28] sm:$0xff] }
  0x2d   :  { %v811_v6 = vsub.s32 0, %v805_v3  ;;  %v614_v18 = vld.sshfl [vmem:[#allocation2 + $0x6] sm:$0x11 pattern:$0x75316420]  ;;  %v150_v26 = vcombine.high %v613_v13, %v613_v13  ;;  %v344_v56 = vld [vmem:[#allocation5 + $0x38] sm:$0xff] }
  0x2e   :  { %v808_v5 = vsub.s32 %v71_v4, %v805_v3  ;;  %v615_v24 = vld.sshfl [vmem:[#allocation2 + $0x8] sm:$0x11 pattern:$0x75316420]  ;;  %v191_v49 = vcombine.high %v614_v18, %v614_v18  ;;  %vm501_vm1 = vcmask 1041409   ;;  %vm504_vm2 = vcmask 58368  }
  0x2f   :  { %v616_v30 = vld.sshfl [vmem:[#allocation2 + $0xa] sm:$0x11 pattern:$0x75316420]  ;;  %s765_s0 = smov [#allocation8]  }
  0x30   :  { %v75_v8 = vrot.slane %v611_v7, %v808_v5  ;;  %v116_v12 = vrot.slane %v612_v9, %v808_v5  ;;  %v157_v17 = vrot.slane %v613_v13, %v808_v5  ;;  %v82_v19 = vrot.slane %v68_v10, %v808_v5  ;;  %v617_v36 = vld.sshfl [vmem:[#allocation2 + $0xc] sm:$0x11 pattern:$0x75316420]  ;;  %v303_v52 = vld [vmem:[#allocation5 + $0x30] sm:$0xff]  ;;  %s584_s2 = sshll.u32 %s765_s0, 4  ;;  %s585_s2 = int_to_ptr.vmem [resolvable:$true] %s584_s2 }
  0x31   :  { %v198_v23 = vrot.slane %v614_v18, %v808_v5  ;;  %v123_v25 = vrot.slane %v109_v14, %v808_v5  ;;  %v239_v29 = vrot.slane %v615_v24, %v808_v5  ;;  %v280_v35 = vrot.slane %v616_v30, %v808_v5  ;;  %v618_v42 = vld.sshfl [vmem:[#allocation2 + $0xe] sm:$0x11 pattern:$0x75316420]  ;;  %s708_s7 = scalar_lea.vmem %s585_s2, 256  ;;  %p713_p2 = scmp.lt.s32.totalorder %s585_s2, %s585_s2 }
  0x32   :  { %v86_v15 = vrot.slane %v75_v8, %v811_v6  ;;  %v127_v21 = vrot.slane %v116_v12, %v811_v6  ;;  %v168_v28 = vrot.slane %v157_v17, %v811_v6  ;;  %v90_v31 = vrot.slane %v82_v19, %v811_v6  ;;  %v619_v47 = vld.sshfl [vmem:[#allocation2 + $0x10] sm:$0x11 pattern:$0x75316420]  ;;  %p709_p1 = scmp.ne.s32.totalorder %s585_s2, %s708_s7  ;;  %p714_p3 = scmp.lt.s32.totalorder %s708_s7, %s708_s7 }
  0x33   :  { %v209_v34 = vrot.slane %v198_v23, %v811_v6  ;;  %v131_v37 = vrot.slane %v123_v25, %v811_v6  ;;  %v250_v40 = vrot.slane %v239_v29, %v811_v6  ;;  %v321_v41 = vrot.slane %v617_v36, %v808_v5  ;;  %v620_v55 = vld.sshfl [vmem:[#allocation2 + $0x12] sm:$0x11 pattern:$0x75316420] }
  0x34   :  { %v93_v27 = vmul.f32 %v86_v15, %v58_v11  ;;  %v134_v32 = vmul.f32 %v127_v21, %v98_v16  ;;  %v175_v39 = vmul.f32 %v168_v28, %v139_v22  ;;  %v291_v45 = vrot.slane %v280_v35, %v811_v6  ;;  %p715_p4 = por %p714_p3, %p713_p2 }
  0x35   :  { %v362_v46 = vrot.slane %v618_v42, %v808_v5  ;;  %v94_v48 = vmul.f32 %v90_v31, %v58_v11  ;;  %v216_v51 = vmul.f32 %v209_v34, %v180_v33  ;;  %v332_v53 = vrot.slane %v321_v41, %v811_v6  ;;  %v426_v31 = vld [vmem:[#allocation5 + $0x48] sm:$0xff] }
  0x36   :  { %v95_v38 = vadd.f32 %v93_v27, %v57_v20  ;;  %v403_v54 = vrot.slane %v619_v47, %v808_v5  ;;  %v444_v58 = vrot.slane %v620_v55, %v808_v5  ;;  %v257_v61 = vmul.f32 %v250_v40, %v221_v43  ;;  %p716_p5 = pnand %p715_p4, %p709_p1 }
  0x37   :  { %v373_v57 = vrot.slane %v362_v46, %v811_v6  ;;  %v96_v59 = vadd.f32 %v94_v48, %v57_v20  ;;  %v298_v62 = vmul.f32 %v291_v45, %v262_v44  ;;  %v135_v63 = vmul.f32 %v131_v37, %v98_v16  ;;  %v385_v20 = vld [vmem:[#allocation5 + $0x40] sm:$0xff] }
  0x38   :  { %v136_v50 = vadd.f32 %v134_v32, %v95_v38  ;;  %v339_v1 = vmul.f32 %v332_v53, %v303_v52  ;;  %v414_v2 = vrot.slane %v403_v54, %v811_v6  ;;  %v164_v4 = vrot.slane %v150_v26, %v808_v5 }
  0x39   :  { %v205_v7 = vrot.slane %v191_v49, %v808_v5  ;;  %v380_v9 = vmul.f32 %v373_v57, %v344_v56  ;;  %v455_v10 = vrot.slane %v444_v58, %v811_v6  ;;  %v232_v11 = vcombine.high %v615_v24, %v615_v24 }
  0x3a   :  { %v177_v60 = vadd.f32 %v175_v39, %v136_v50  ;;  %v137_v12 = vadd.f32 %v135_v63, %v96_v59  ;;  %v172_v13 = vrot.slane %v164_v4, %v811_v6  ;;  %v273_v15 = vcombine.high %v616_v30, %v616_v30 }
  0x3b   :  { %v213_v14 = vrot.slane %v205_v7, %v811_v6  ;;  %v246_v16 = vrot.slane %v232_v11, %v808_v5  ;;  %v314_v18 = vcombine.high %v617_v36, %v617_v36  ;;  %v355_v19 = vcombine.high %v618_v42, %v618_v42 }
  0x3c   :  { %v218_v8 = vadd.f32 %v216_v51, %v177_v60  ;;  %v176_v21 = vmul.f32 %v172_v13, %v139_v22  ;;  %v287_v25 = vrot.slane %v273_v15, %v808_v5  ;;  %v396_v26 = vcombine.high %v619_v47, %v619_v47 }
  0x3d   :  { %v217_v23 = vmul.f32 %v213_v14, %v180_v33  ;;  %v254_v24 = vrot.slane %v246_v16, %v811_v6  ;;  %v328_v28 = vrot.slane %v314_v18, %v808_v5  ;;  %v369_v29 = vrot.slane %v355_v19, %v808_v5 }
  0x3e   :  { %v259_v17 = vadd.f32 %v257_v61, %v218_v8  ;;  %v178_v30 = vadd.f32 %v176_v21, %v137_v12  ;;  %v295_v32 = vrot.slane %v287_v25, %v811_v6  ;;  %v410_v34 = vrot.slane %v396_v26, %v808_v5 }
  0x3f   :  { %v437_v35 = vcombine.high %v620_v55, %v620_v55  ;;  %v421_v22 = vmul.f32 %v414_v2, %v385_v20  ;;  %v258_v33 = vmul.f32 %v254_v24, %v221_v43  ;;  %v336_v37 = vrot.slane %v328_v28, %v811_v6 }
  0x40   :  { %v300_v27 = vadd.f32 %v298_v62, %v259_v17  ;;  %v219_v38 = vadd.f32 %v217_v23, %v178_v30  ;;  %v299_v39 = vmul.f32 %v295_v32, %v262_v44  ;;  %v377_v40 = vrot.slane %v369_v29, %v811_v6 }
  0x41   :  { %v451_v41 = vrot.slane %v437_v35, %v808_v5  ;;  %v462_v45 = vmul.f32 %v455_v10, %v426_v31  ;;  %v471_v46 = vand.u32 127, %v72_v0  ;;  %v340_v48 = vmul.f32 %v336_v37, %v303_v52 }
  0x42   :  { %v341_v36 = vadd.f32 %v339_v1, %v300_v27  ;;  %v260_v47 = vadd.f32 %v258_v33, %v219_v38  ;;  %v418_v49 = vrot.slane %v410_v34, %v811_v6  ;;  %v381_v53 = vmul.f32 %v377_v40, %v344_v56 }
  0x43   :  { %v459_v43 = vrot.slane %v451_v41, %v811_v6  ;;  %vm472_vm0 = vcmp.lt.s32.totalorder %v471_v46, 125  ;;  %v855_v11 = vsub.s32 %v471_v46, %v805_v3  ;;  %v764_v18 = vmov 0  }
  0x44   :  { %v382_v42 = vadd.f32 %v380_v9, %v341_v36  ;;  %v301_v51 = vadd.f32 %v299_v39, %v260_v47  ;;  %v422_v55 = vmul.f32 %v418_v49, %v385_v20  ;;  %633 = vset.pattern.permute.xlu0 %v764_v18  ;;  %632 = vset.pattern.permute.xlu1 %v764_v18  ;;  %v515_v19 = vsub.s32 1, %v805_v3 }
  0x45   :  { %v463_v5 = vmul.f32 %v459_v43, %v426_v31 }
  0x46   :  { %v423_v50 = vadd.f32 %v421_v22, %v382_v42  ;;  %v342_v44 = vadd.f32 %v340_v48, %v301_v51 }
  0x48   :  { %v464_v54 = vadd.f32 %v462_v45, %v423_v50  ;;  %v383_v58 = vadd.f32 %v381_v53, %v342_v44 }
  0x4a   :  { %v466_v57 = vmax.f32 %v464_v54, 0.0  ;;  %v424_v0 = vadd.f32 %v422_v55, %v383_v58 }
  0x4c   :  { %v473_v59 = vsel %vm472_vm0, %v466_v57, -inf  ;;  %468 = vst [vmem:[#allocation8] sm:$0xff] %v466_v57  ;;  %v465_v60 = vadd.f32 %v463_v5, %v424_v0 }
  0x4d   :  { %475 = vmax.xlane.f32.xlu0 %v473_v59 }
  0x4e   :  { %v467_v52 = vmax.f32 %v465_v60, 0.0 }
  0x50   :  { %v474_v61 = vsel %vm472_vm0, %v467_v52, -inf  ;;  %469 = vst [vmem:[#allocation8 + $0x8] sm:$0xff] %v467_v52 }
  0x51   :  { %477 = vmax.xlane.f32.xlu0 %v474_v61 }
  0xd6   :  { %v476_v62 = vpop.xlane.xlu0 %475 }
  0xd7   :  { %v479_v56 = vsub.f32 %v473_v59, %v476_v62 }
  0xd9   :  { %v481_v63 = vmul.f32 1.442695, %v479_v56 }
  0xda   :  { %v478_v1 = vpop.xlane.xlu0 %477 }
  0xdb   :  { %634 = vpow2.f32 %v481_v63  ;;  %v480_v2 = vsub.f32 %v474_v61, %v478_v1 }
  0xdd   :  { %v483_v4 = vmul.f32 1.442695, %v480_v2 }
  0xdf   :  { %636 = vpow2.f32 %v483_v4 }
  0xe8   :  { %v635_v7 = vpop.eup %634 }
  0xe9   :  { %485 = vadd.xlane.f32.xlu1 %v635_v7 }
  0xec   :  { %v637_v8 = vpop.eup %636 }
  0xed   :  { %487 = vadd.xlane.f32.xlu1 %v637_v8 }
 0x172   :  { %v486_v9 = vpop.xlane.xlu1 %485 }
 0x173   :  { %638 = vrcp.f32 %v486_v9 }
 0x176   :  { %v488_v10 = vpop.xlane.xlu1 %487 }
 0x177   :  { %640 = vrcp.f32 %v488_v10 }
 0x180   :  { %v639_v12 = vpop.eup %638 }
 0x181   :  { %v496_v14 = vrot.slane %v639_v12, %v855_v11 }
 0x184   :  { %v641_v13 = vpop.eup %640 }
 0x185   :  { %v500_v15 = vrot.slane %v641_v13, %v855_v11 }
 0x187   :  { %v502_v17 = vsel %vm501_vm1, %v500_v15, %v496_v14 }
 0x188   :  { %v505_v16 = vsel %vm504_vm2, %v502_v17, -inf }
 0x189   :  { %506 = vmax.xlane.f32.xlu0 %v505_v16 }
 0x212   :  { %v507_v20 = vpop.xlane.xlu0 %506 }
 0x213   :  { %v512_v21 = vrot.slane %v507_v20, %v811_v6  ;;  %v516_v23 = vrot.slane %v507_v20, %v515_v19 }
 0x215   :  { %v519_v25 = vsub.f32 %v639_v12, %v512_v21  ;;  %v520_v26 = vsub.f32 %v641_v13, %v516_v23 }
 0x217   :  { %v521_v27 = vmul.f32 1.442695, %v519_v25  ;;  %v523_v24 = vmul.f32 1.442695, %v520_v26 }
 0x219   :  { %642 = vpow2.f32 %v521_v27 }
 0x21a   :  { %644 = vpow2.f32 %v523_v24 }
 0x226   :  { %v643_v28 = vpop.eup %642 }
 0x227   :  { %v645_v29 = vpop.eup %644  ;;  %528 = vperm.xlu1 %632, %v643_v28  }
 0x228   :  { %531 = vperm.xlu0 %633, %v645_v29  }
 0x2a2   :  { %v529_v31 = vpop.permute.xlu1 %528 }
 0x2a3   :  { %v532_v30 = vpop.permute.xlu0 %531  ;;  %v536_v32 = vrot.slane %v529_v31, %v855_v11 }
 0x2a4   :  { %v540_v3 = vrot.slane %v532_v30, %v855_v11 }
 0x2a6   :  { %v541_v34 = vsel %vm501_vm1, %v540_v3, %v536_v32 }
 0x2a7   :  { %v543_v35 = vsel %vm504_vm2, %v541_v34, 0.0 }
 0x2a8   :  { %544 = vadd.xlane.f32.xlu1 %v543_v35 }
 0x331   :  { %v545_v36 = vpop.xlane.xlu1 %544 }
 0x332   :  { %646 = vrcp.f32 %v545_v36 }
 0x33f   :  { %v647_v22 = vpop.eup %646 }
 0x340   :  { %v551_v33 = vrot.slane %v647_v22, %v811_v6  ;;  %v555_v38 = vrot.slane %v647_v22, %v515_v19 }
 0x342   :  { %v558_v37 = vmul.f32 %v643_v28, %v551_v33  ;;  %v559_v39 = vmul.f32 %v645_v29, %v555_v38 }
 0x344   :  { %563 = vperm.xlu0 %633, %v558_v37  }
 0x345   :  { %719 = shalt.err (!%p716_p5)
}
 0x346   :  { %590 = dma.vmem_to_hbm [thread:$0]  %s585_s2, 256, %s884_s3, [#allocation4], %s757_s18, %s757_s18, %s758_s19  }
 0x347   :  { %s766_s10 = smov [#allocation9]  }
 0x348   :  { %566 = vperm.xlu0 %633, %v559_v39   ;;  %s597_s11 = sshll.u32 %s766_s10, 4  ;;  %s598_s11 = int_to_ptr.vmem [resolvable:$true] %s597_s11 }
 0x349   :  { %s728_s12 = scalar_lea.vmem %s598_s11, 32  ;;  %p733_p7 = scmp.lt.s32.totalorder %s598_s11, %s598_s11 }
 0x34a   :  { %p729_p6 = scmp.ne.s32.totalorder %s598_s11, %s728_s12  ;;  %p734_p8 = scmp.lt.s32.totalorder %s728_s12, %s728_s12 }
 0x34c   :  { %p735_p9 = por %p734_p8, %p733_p7 }
 0x34e   :  { %p736_p10 = pnand %p735_p9, %p729_p6 }
 0x3bf   :  { %v564_v6 = vpop.permute.xlu0 %563 }
 0x3c0   :  { %v571_v41 = vrot.slane %v564_v6, %v855_v11 }
 0x3c3   :  { %v567_v40 = vpop.permute.xlu0 %566 }
 0x3c4   :  { %v575_v42 = vrot.slane %v567_v40, %v855_v11 }
 0x3c6   :  { %v576_v45 = vsel %vm501_vm1, %v575_v42, %v571_v41 }
 0x3c7   :  { %578 = vst.msk [vmem:[#allocation9] sm:$0x3] %vm504_vm2, %v576_v45 }
 0x3c8   :  { %739 = shalt.err (!%p736_p10)
}
 0x3c9   :  { %600 = dma.vmem_to_hbm [thread:$0]  %s598_s11, 32, %s885_s4, [#allocation10]  }
 0x3ca   :  { %752 = dma.done.wait [#allocation4], 256  }
 0x3cb   :  { %753 = vsyncadd [#allocation4], 4294967040 }
 0x3cc   :  { %754 = dma.done.wait [#allocation10], 32  }
 0x3cd   :  { %755 = vsyncadd [#allocation10], 4294967264 }
 0x3ce   :  { %607 = vsyncpa [#allocation3], 1 }
 0x3cf   :  { %608 = vsyncpa [#allocation6], 1 }
 0x3d0   :  { %609 = vsyncpa [#allocation4], 1 }
 0x3d1   :  { %610 = vsyncpa [#allocation10], 1 }

</bundles_post_ra>
